<compile_context>
chip_gen: v7x
topology: tpu7x:2x2x1
jax: 0.10.0
libtpu: 0.0.40
codegen_flags: <defaults>
</compile_context>

<pallas_src>
import jax
import jax.numpy as jnp
from jax.experimental import pallas as pl
from jax.experimental.pallas import tpu as pltpu


NEG_SLOPE = 0.01  # nn.LeakyReLU default negative_slope
MAX_TILE_ROWS = 1024  # batch-tile rows (multiple of 8); ~1.3 MiB/step double-buffered


def _mlp_kernel(x_ref, w_ref, b_ref, o_ref):
    # x tile: (TB, K) f32; w: (K, N) bf16 resident; b: (1, N) f32 resident.
    x = x_ref[...].astype(jnp.bfloat16)            # bf16 into the MXU
    w = w_ref[...]                                 # already bf16
    y = jnp.dot(x, w, preferred_element_type=jnp.float32)  # f32 accumulate (MXU)
    y = y + b_ref[...]                             # bias add in f32 (VPU)
    y = jnp.where(y >= 0, y, NEG_SLOPE * y)        # LeakyReLU (VPU)
    o_ref[...] = y.astype(o_ref.dtype)


def _mlp_pallas(x_in, w_in, b_in, tb):
    rows, k = x_in.shape
    n = w_in.shape[1]
    grid = (pl.cdiv(rows, tb),)
    return pl.pallas_call(
        _mlp_kernel,
        out_shape=jax.ShapeDtypeStruct((rows, n), jnp.float32),
        grid_spec=pl.GridSpec(
            grid=grid,
            in_specs=[
                pl.BlockSpec((tb, k), lambda i: (i, 0)),   # batch-tiled activations
                pl.BlockSpec((k, n), lambda i: (0, 0)),    # weight: VMEM-resident
                pl.BlockSpec((1, n), lambda i: (0, 0)),    # bias: VMEM-resident
            ],
            out_specs=pl.BlockSpec((tb, n), lambda i: (i, 0)),
        ),
        compiler_params=pltpu.CompilerParams(
            # Batch tiles are independent -> shard across v7x's 2 TensorCores.
            dimension_semantics=("parallel",),
        ),
    )(x_in, w_in, b_in)


def simple_mlp(x, w, b):
    """x: (B, input_dim) f32; w: (input_dim, output_dim); b: (output_dim,)."""
    B, in_dim = x.shape
    out_dim = w.shape[1]
    w_bf16 = w.astype(jnp.bfloat16)
    b_f32 = b.reshape(1, out_dim).astype(jnp.float32)

    if B % 2 == 0 and B >= 2:
        # Lane-dense packing: two batch rows per kernel row, block-diagonal
        # weight => output block is 2*out_dim = 128 lanes wide (unmasked vst).
        x_in = x.reshape(B // 2, 2 * in_dim)
        z = jnp.zeros((in_dim, out_dim), jnp.bfloat16)
        w_in = jnp.concatenate(
            [jnp.concatenate([w_bf16, z], axis=1),
             jnp.concatenate([z, w_bf16], axis=1)],
            axis=0,
        )
        b_in = jnp.tile(b_f32, (1, 2))
    else:
        # Odd batch: plain path (output stores are masked at 64 lanes).
        x_in, w_in, b_in = x, w_bf16, b_f32

    rows = x_in.shape[0]
    # Single (possibly sub-8) full-extent block for small batches; 1024-row
    # (multiple-of-8) tiles with pipelining for large batches.
    tb = rows if rows <= MAX_TILE_ROWS else MAX_TILE_ROWS

    y = _mlp_pallas(x_in, w_in, b_in, tb)
    return y.reshape(B, out_dim)


def init_params(key, input_dim=16, output_dim=64):
    # PyTorch nn.Linear default init: U(-1/sqrt(in), 1/sqrt(in)) for w and b.
    kw, kb = jax.random.split(key)
    bound = 1.0 / jnp.sqrt(float(input_dim))
    # Stored already transposed to (input_dim, output_dim).
    w = jax.random.uniform(kw, (input_dim, output_dim), jnp.float32, -bound, bound)
    b = jax.random.uniform(kb, (output_dim,), jnp.float32, -bound, bound)
    return w, b


if __name__ == "__main__":
    key = jax.random.PRNGKey(0)
    kx, kp = jax.random.split(key)

    batch = 8
    input_dim = 16
    output_dim = 64

    x = jax.random.normal(kx, (batch, input_dim), jnp.float32)
    w, b = init_params(kp, input_dim, output_dim)

    out = jax.jit(simple_mlp)(x, w, b)
    out = jax.block_until_ready(out)

    # Reference with matching semantics (bf16 matmul inputs, f32 accumulate).
    ref = jnp.dot(x.astype(jnp.bfloat16), w.astype(jnp.bfloat16),
                  preferred_element_type=jnp.float32) + b[None, :]
    ref = jnp.where(ref >= 0, ref, NEG_SLOPE * ref)

    assert out.shape == (batch, output_dim)
    assert jnp.allclose(out, ref, atol=1e-4, rtol=1e-4), \
        float(jnp.max(jnp.abs(out - ref)))

    print("KERNEL_OK")
</pallas_src>

<mosaic_0001>
module attributes {stable_mosaic.version = 11 : i64} {
  func.func @_mlp_kernel(%arg0: i32, %arg1: memref<4x32xf32, #tpu.memory_space<vmem>>, %arg2: memref<32x128xbf16, #tpu.memory_space<vmem>>, %arg3: memref<1x128xf32, #tpu.memory_space<vmem>>, %arg4: memref<4x128xf32, #tpu.memory_space<vmem>>) attributes {dimension_semantics = [#tpu.dimension_semantics<parallel>], iteration_bounds = array<i64: 1>, scalar_prefetch = 0 : i64, scratch_operands = 0 : i64, tpu.core_type = #tpu.core_type<tc>, window_params = [{transform_indices = @transform_0, window_bounds = array<i64: 4, 32>}, {pipeline_mode = #tpu.pipeline_mode<synchronous>, transform_indices = @transform_1, window_bounds = array<i64: 32, 128>}, {pipeline_mode = #tpu.pipeline_mode<synchronous>, transform_indices = @transform_2, window_bounds = array<i64: 1, 128>}, {transform_indices = @transform_3, window_bounds = array<i64: 4, 128>}]} {
    %c0 = arith.constant 0 : index
    %c0_0 = arith.constant 0 : index
    %0 = vector.load %arg1[%c0, %c0_0] : memref<4x32xf32, #tpu.memory_space<vmem>>, vector<4x32xf32>
    %1 = arith.truncf %0 : vector<4x32xf32> to vector<4x32xbf16>
    %c0_1 = arith.constant 0 : index
    %c0_2 = arith.constant 0 : index
    %2 = vector.load %arg2[%c0_1, %c0_2] : memref<32x128xbf16, #tpu.memory_space<vmem>>, vector<32x128xbf16>
    %cst = arith.constant dense<0.000000e+00> : vector<4x128xf32>
    %3 = tpu.matmul %1, %2, %cst {dimension_numbers = #tpu.dot_dimension_numbers<[1], [0], [0], [1], [0, 0, 1, 1], [], []>} : vector<4x32xbf16>, vector<32x128xbf16>, vector<4x128xf32> -> vector<4x128xf32>
    %c0_3 = arith.constant 0 : index
    %c0_4 = arith.constant 0 : index
    %4 = vector.load %arg3[%c0_3, %c0_4] : memref<1x128xf32, #tpu.memory_space<vmem>>, vector<1x128xf32>
    %5 = vector.broadcast %4 : vector<1x128xf32> to vector<4x128xf32>
    %6 = arith.addf %3, %5 : vector<4x128xf32>
    %cst_5 = arith.constant 0.000000e+00 : f32
    %7 = vector.broadcast %cst_5 : f32 to vector<4x128xf32>
    %8 = arith.cmpf oge, %6, %7 : vector<4x128xf32>
    %cst_6 = arith.constant 0.00999999977 : f32
    %9 = vector.broadcast %cst_6 : f32 to vector<4x128xf32>
    %10 = arith.mulf %9, %6 : vector<4x128xf32>
    %11 = arith.select %8, %6, %10 : vector<4x128xi1>, vector<4x128xf32>
    %c0_7 = arith.constant 0 : index
    %c0_8 = arith.constant 0 : index
    %12 = vector.load %arg4[%c0_7, %c0_8] : memref<4x128xf32, #tpu.memory_space<vmem>>, vector<4x128xf32>
    tpu.vector_store %arg4[%c0_7, %c0_8], %11 {strides = array<i32>} : memref<4x128xf32, #tpu.memory_space<vmem>>, vector<4x128xf32>,
    return
  }
  func.func @transform_0(%arg0: i32) -> (i32, i32) {
    %c0_i32 = arith.constant 0 : i32
    %c0_i32_0 = arith.constant 0 : i32
    return %arg0, %c0_i32 : i32, i32
  }
  func.func @transform_1(%arg0: i32) -> (i32, i32) {
    %c0_i32 = arith.constant 0 : i32
    %c0_i32_0 = arith.constant 0 : i32
    %c0_i32_1 = arith.constant 0 : i32
    return %c0_i32, %c0_i32_0 : i32, i32
  }
  func.func @transform_2(%arg0: i32) -> (i32, i32) {
    %c0_i32 = arith.constant 0 : i32
    %c0_i32_0 = arith.constant 0 : i32
    %c0_i32_1 = arith.constant 0 : i32
    return %c0_i32, %c0_i32_0 : i32, i32
  }
  func.func @transform_3(%arg0: i32) -> (i32, i32) {
    %c0_i32 = arith.constant 0 : i32
    %c0_i32_0 = arith.constant 0 : i32
    return %arg0, %c0_i32 : i32, i32
  }
}

</mosaic_0001>

<bundles_post_ra>
// kernel: simple_mlp.1
= control target key start
LH: loop header
LB: loop body
LE: loop exit
PB: predicated region body
PF: predicated region fallthrough
CT: control target
= control target key end

     0   :  { %v111_v0 = vmov 0.0   ;;  %vm112_vm0 = vmmov 0   ;;  %vm40_vm1 = vcmask 261120   ;;  %s148_s1 = inlined_call_operand.vmem [shape: bf16[32,128], index: 1, kind: input, shape index: {}]   ;;  %s149_s0 = inlined_call_operand.vmem [shape: f32[4,32], index: 0, kind: input, shape index: {}]   ;;  %s150_s2 = inlined_call_operand.vmem [shape: f32[1,128], index: 2, kind: input, shape index: {}]   ;;  %s151_s3 = inlined_call_operand.vmem [shape: f32[4,128], index: 3, kind: output, shape index: {}]  }
   0x1   :  { %99 = vmatprep.subr.bf16.mxu0 %v111_v0  ;;  %v109_v1 = vld [vmem:[%s148_s1] sm:$0xff]   ;;  %103 = vmatprep.mubr.msk.bf16.mxu0 %vm112_vm0, %v111_v0  ;;  %v110_v2 = vld [vmem:[%s148_s1 + $0x8] sm:$0xff]  }
   0x2   :  { %100 = vmatpush3.bf16.msra.mxu0 %v109_v1  ;;  %v15_v3 = vld [vmem:[%s149_s0] sm:$0xf] }
   0x3   :  { %101 = vmatprep.subr.bf16.mxu0 %v111_v0  ;;  %v16_v4 = vpack.c.bf16 %v15_v3, %v15_v3  ;;  %v92_v5 = vld [vmem:[%s150_s2] ss:$0 sm:$0xff] }
   0x6   :  { %102 = vmatpush3.bf16.msra.mxu0 %v110_v2 }
   0x9   :  { %104 = vmatmul.mubr.msk.bf16.vlgmr.msra.gmra.mrb[0].mxu0 %vm40_vm1, %v16_v4 }
  0xdc   :  { %v78_v6 = vpop.f32.mrb[0].mxu0 }
  0xdd   :  { %v79_v7 = vadd.f32 %v92_v5, %v78_v6  ;;  %v105_v8 = vpop.f32.mrb[1].mxu0 }
  0xde   :  { %v81_v9 = vpop.f32.mrb[2].mxu0 }
  0xdf   :  { %vm84_vm2 = vcmp.ge.f32.partialorder %v79_v7, 0.0  ;;  %v85_v10 = vmul.f32 0.01, %v79_v7  ;;  %v106_v11 = vpop.f32.mrb[3].mxu0 }
  0xe1   :  { %v86_v12 = vsel %vm84_vm2, %v79_v7, %v85_v10 }
  0xe2   :  { %87 = vst [vmem:[%s151_s3] sm:$0xf] %v86_v12 }

</bundles_post_ra>
